<compile_context>
chip_gen: v7x
topology: tpu7x:2x2x1
jax: 0.10.0
libtpu: 0.0.40
codegen_flags: <defaults>
</compile_context>

<pallas_src>
import jax
import jax.numpy as jnp
from jax.experimental import pallas as pl
from jax.experimental.pallas import tpu as pltpu

EPS = 1e-5
_N_PARTIALS = 2     # leading "parallel" grid axis (2 TCs on v7x; harmless on v5e/v6e)
_SUBLANES = 8
_FP32 = 4


def _round_up(x, m):
    return ((x + m - 1) // m) * m


def _tile_plan(batch, max_tile):
    """Pick a batch tile (multiple of 8, <= max_tile) and pad the batch so the
    grid is exactly (_N_PARTIALS, tiles_per_partial) with no ragged tail."""
    tb = min(max_tile,
             _round_up(max(pl.cdiv(batch, _N_PARTIALS), _SUBLANES), _SUBLANES))
    tiles_per_partial = pl.cdiv(batch, _N_PARTIALS * tb)
    b_pad = _N_PARTIALS * tiles_per_partial * tb
    return tb, tiles_per_partial, b_pad


def _vmem_limit(need_bytes):
    # 2x margin over the computed per-step working set; 32 MiB floor covers
    # compiler-internal scratch, 48 MiB cap stays inside v7x's 64 MiB/TC.
    return int(min(max(2 * need_bytes, 32 * 1024 * 1024), 48 * 1024 * 1024))


def _resident(arr):
    """VMEM-resident operand: constant block index across the grid, and
    single-buffered (the block never changes, double-buffering wastes VMEM)."""
    return pl.BlockSpec(arr.shape, lambda c, i: (0, 0),
                        pipeline_mode=pl.Buffered(1))


def _mxu_dot(a, b, use_bf16):
    if use_bf16:
        a = a.astype(jnp.bfloat16)
        b = b.astype(jnp.bfloat16)
    return jnp.dot(a, b, preferred_element_type=jnp.float32)


# --------------------------------------------------------------------------
# Pass 1: h1 = x @ W1 ; accumulate per-feature sum and sum-of-squares of h1
# into an (8, H) sublane-shaped partial (one per "parallel" partial row).
# Padded zero rows contribute exactly 0 (biases dropped), so no mask needed.
# --------------------------------------------------------------------------
def _make_stats1_kernel(tb, use_bf16):
    groups = tb // _SUBLANES

    def kernel(x_ref, w1_ref, sum_ref, sq_ref):
        @pl.when(pl.program_id(1) == 0)
        def _init():
            sum_ref[...] = jnp.zeros_like(sum_ref)
            sq_ref[...] = jnp.zeros_like(sq_ref)

        h = _mxu_dot(x_ref[...], w1_ref[...], use_bf16)          # (tb, H) f32
        h3 = h.reshape(groups, _SUBLANES, h.shape[-1])           # sublane-aligned split
        sum_ref[...] += jnp.sum(h3, axis=0)                      # (8, H): pure VALU adds
        sq_ref[...] += jnp.sum(h3 * h3, axis=0)

    return kernel


# --------------------------------------------------------------------------
# Pass 2: recompute h1, apply folded BN1 (scale*h + shift) + ReLU,
# z = . @ W2_pad (lane-padded to 128).  Writes z (lane-dense store) and
# accumulates masked sum / sumsq of z into (8, 128) partials.
# --------------------------------------------------------------------------
def _make_layer2_kernel(tb, tiles_per_partial, batch, b_pad, use_bf16):
    groups = tb // _SUBLANES
    need_mask = b_pad > batch   # padded rows give relu(shift1) != 0 -> must mask stats

    def kernel(x_ref, w1_ref, sc1_ref, sh1_ref, w2_ref, z_ref, sum_ref, sq_ref):
        @pl.when(pl.program_id(1) == 0)
        def _init():
            sum_ref[...] = jnp.zeros_like(sum_ref)
            sq_ref[...] = jnp.zeros_like(sq_ref)

        h = _mxu_dot(x_ref[...], w1_ref[...], use_bf16)
        h = jnp.maximum(h * sc1_ref[...] + sh1_ref[...], 0.0)    # folded BN1 + ReLU
        z = _mxu_dot(h, w2_ref[...], use_bf16)
        z_ref[...] = z                                           # lane-dense 128-wide store

        if need_mask:
            tile = pl.program_id(0) * tiles_per_partial + pl.program_id(1)
            rows = tile * tb + jax.lax.broadcasted_iota(jnp.int32, z.shape, 0)
            z = jnp.where(rows < batch, z, 0.0)                  # padded rows -> 0 in stats

        z3 = z.reshape(groups, _SUBLANES, z.shape[-1])
        sum_ref[...] += jnp.sum(z3, axis=0)
        sq_ref[...] += jnp.sum(z3 * z3, axis=0)

    return kernel


def parametric_umap_forward(x, params, *, max_batch_tile=512, use_bf16_matmul=False):
    """Forward of Linear(512) -> BN1d -> ReLU -> Linear(latent) -> BN1d.

    max_batch_tile: 512 is safe on every generation (v7x: 64 MiB VMEM/TC);
      v5e/v6e (128 MiB VMEM) can pass 1024 to amortise per-step overhead more.
    use_bf16_matmul: cast matmul operands to bf16 (~3-4x MXU throughput), BN
      statistics stay f32.  Off by default for f32 fidelity with PyTorch.
    """
    x = x.astype(jnp.float32)
    B, D_in = x.shape
    w1 = params["w1"]                       # (D_in, H)  == torch weight.T
    g1, be1 = params["g1"], params["be1"]   # (1, H)
    w2 = params["w2"]                       # (H, latent)
    g2, be2 = params["g2"], params["be2"]   # (1, latent)
    H = w1.shape[1]
    latent = w2.shape[1]

    DP = _round_up(latent, 128)             # lane-pad latent for MXU / dense stores
    w2p = jnp.pad(w2, ((0, 0), (0, DP - latent)))

    tb, tiles_per_partial, b_pad = _tile_plan(B, max_batch_tile)
    if b_pad > B:
        x = jnp.pad(x, ((0, b_pad - B), (0, 0)))   # zero rows: neutral for pass-1 stats

    grid = (_N_PARTIALS, tiles_per_partial)
    sem = ("parallel", "arbitrary")   # partial axis -> megacore; batch tiles -> reduction
    x_spec = pl.BlockSpec((tb, D_in), lambda c, i: (c * tiles_per_partial + i, 0))
    stats1_spec = pl.BlockSpec((None, _SUBLANES, H), lambda c, i: (c, 0, 0))
    stats2_spec = pl.BlockSpec((None, _SUBLANES, DP), lambda c, i: (c, 0, 0))

    # -------------------- pass 1: BN1 batch statistics --------------------
    p1_need = (2 * tb * D_in + D_in * H + 4 * _SUBLANES * H) * _FP32
    sum1_p, sq1_p = pl.pallas_call(
        _make_stats1_kernel(tb, use_bf16_matmul),
        out_shape=(
            jax.ShapeDtypeStruct((_N_PARTIALS, _SUBLANES, H), jnp.float32),
            jax.ShapeDtypeStruct((_N_PARTIALS, _SUBLANES, H), jnp.float32),
        ),
        grid_spec=pltpu.PrefetchScalarGridSpec(
            num_scalar_prefetch=0,
            grid=grid,
            in_specs=[x_spec, _resident(w1)],
            out_specs=(stats1_spec, stats1_spec),
        ),
        compiler_params=pltpu.CompilerParams(
            dimension_semantics=sem,
            vmem_limit_bytes=_vmem_limit(p1_need),
        ),
        cost_estimate=pl.CostEstimate(
            flops=2 * b_pad * D_in * H + 4 * b_pad * H,
            transcendentals=0,
            bytes_accessed=(b_pad * D_in + D_in * H
                            + 4 * _N_PARTIALS * _SUBLANES * H) * _FP32,
        ),
    )(x, w1)

    sum1 = jnp.sum(sum1_p, axis=(0, 1))[None, :]    # reduce partial rows + 8 sublanes
    sq1 = jnp.sum(sq1_p, axis=(0, 1))[None, :]
    mean1 = sum1 / B
    # One-pass E[h^2]-E[h]^2 biased variance (training-mode BN).
    # TODO(synk): for data with |mean| >> std this cancels catastrophically in
    # f32; a centered second pass would be needed for such inputs.
    var1 = jnp.maximum(sq1 / B - mean1 * mean1, 0.0)
    scale1 = g1 * jax.lax.rsqrt(var1 + EPS)
    shift1 = be1 - mean1 * scale1

    # ---------- pass 2: folded BN1 + ReLU + second matmul + BN2 stats ----------
    p2_need = (2 * tb * D_in + D_in * H + H * DP + 2 * H
               + 2 * tb * DP + 4 * _SUBLANES * DP) * _FP32
    z, sum2_p, sq2_p = pl.pallas_call(
        _make_layer2_kernel(tb, tiles_per_partial, B, b_pad, use_bf16_matmul),
        out_shape=(
            jax.ShapeDtypeStruct((b_pad, DP), jnp.float32),
            jax.ShapeDtypeStruct((_N_PARTIALS, _SUBLANES, DP), jnp.float32),
            jax.ShapeDtypeStruct((_N_PARTIALS, _SUBLANES, DP), jnp.float32),
        ),
        grid_spec=pltpu.PrefetchScalarGridSpec(
            num_scalar_prefetch=0,
            grid=grid,
            in_specs=[x_spec, _resident(w1), _resident(scale1),
                      _resident(shift1), _resident(w2p)],
            out_specs=(
                pl.BlockSpec((tb, DP), lambda c, i: (c * tiles_per_partial + i, 0)),
                stats2_spec,
                stats2_spec,
            ),
        ),
        compiler_params=pltpu.CompilerParams(
            dimension_semantics=sem,
            vmem_limit_bytes=_vmem_limit(p2_need),
        ),
        cost_estimate=pl.CostEstimate(
            flops=(2 * b_pad * D_in * H + 2 * b_pad * H * DP
                   + 6 * b_pad * H + 5 * b_pad * DP),
            transcendentals=0,
            bytes_accessed=(b_pad * D_in + D_in * H + H * DP + 2 * H
                            + b_pad * DP + 4 * _N_PARTIALS * _SUBLANES * DP) * _FP32,
        ),
    )(x, w1, scale1, shift1, w2p)

    # -------- epilogue (was pass 3): BN2 apply fused with the latent slice --------
    sum2 = jnp.sum(sum2_p, axis=(0, 1))[None, :latent]
    sq2 = jnp.sum(sq2_p, axis=(0, 1))[None, :latent]
    mean2 = sum2 / B
    var2 = jnp.maximum(sq2 / B - mean2 * mean2, 0.0)
    scale2 = g2 * jax.lax.rsqrt(var2 + EPS)
    shift2 = be2 - mean2 * scale2
    return z[:B, :latent] * scale2 + shift2


def init_params(key, input_dim, latent_dim, hidden=512):
    """Deterministic synthetic parameters (PyTorch-like fan-in uniform init)."""
    k1, k2, k3, k4, k5, k6 = jax.random.split(key, 6)
    lim1 = 1.0 / jnp.sqrt(input_dim)
    lim2 = 1.0 / jnp.sqrt(hidden)
    return {
        # Linear weights stored pre-transposed as (in, out) == torch_weight.T
        "w1": jax.random.uniform(k1, (input_dim, hidden), jnp.float32, -lim1, lim1),
        "b1": jax.random.uniform(k2, (1, hidden), jnp.float32, -lim1, lim1),
        "w2": jax.random.uniform(k3, (hidden, latent_dim), jnp.float32, -lim2, lim2),
        "b2": jax.random.uniform(k4, (1, latent_dim), jnp.float32, -lim2, lim2),
        # BatchNorm affine params (small gamma perturbation to exercise the path)
        "g1": 1.0 + 0.01 * jax.random.normal(k5, (1, hidden), jnp.float32),
        "be1": jnp.zeros((1, hidden), jnp.float32),
        "g2": 1.0 + 0.01 * jax.random.normal(k6, (1, latent_dim), jnp.float32),
        "be2": jnp.zeros((1, latent_dim), jnp.float32),
    }


def _reference_forward(x, p):
    """Plain-JAX reference matching the PyTorch module (WITH linear biases,
    training-mode BatchNorm).  The kernels drop the biases because they cancel
    exactly under batch normalization; allclose against this proves it."""
    h = x @ p["w1"] + p["b1"]
    m1 = h.mean(0, keepdims=True)
    v1 = ((h - m1) ** 2).mean(0, keepdims=True)
    h = (h - m1) / jnp.sqrt(v1 + EPS) * p["g1"] + p["be1"]
    h = jnp.maximum(h, 0.0)
    z = h @ p["w2"] + p["b2"]
    m2 = z.mean(0, keepdims=True)
    v2 = ((z - m2) ** 2).mean(0, keepdims=True)
    return (z - m2) / jnp.sqrt(v2 + EPS) * p["g2"] + p["be2"]


if __name__ == "__main__":
    # Small deterministic demo: batch 24 (padded to 2 tiles of 16), input_dim 64,
    # latent 16 (lane-padded to 128 inside the kernels).
    B, INPUT_DIM, LATENT_DIM = 24, 64, 16

    key = jax.random.PRNGKey(0)
    kx, kp = jax.random.split(key)
    x = jax.random.normal(kx, (B, INPUT_DIM), jnp.float32)
    params = init_params(kp, INPUT_DIM, LATENT_DIM)

    fwd = jax.jit(parametric_umap_forward)
    out = jax.block_until_ready(fwd(x, params))

    ref = _reference_forward(x, params)
    assert out.shape == (B, LATENT_DIM)
    assert jnp.allclose(out, ref, atol=1e-4, rtol=1e-4), "mismatch vs reference"

    print("KERNEL_OK")
</pallas_src>

<mosaic_0001>
module attributes {stable_mosaic.version = 11 : i64} {
  func.func @kernel(%arg0: i32, %arg1: i32, %arg2: memref<16x64xf32, #tpu.memory_space<vmem>>, %arg3: memref<64x512xf32, #tpu.memory_space<vmem>>, %arg4: memref<1x8x512xf32, #tpu.memory_space<vmem>>, %arg5: memref<1x8x512xf32, #tpu.memory_space<vmem>>) attributes {dimension_semantics = [#tpu.dimension_semantics<parallel>, #tpu.dimension_semantics<arbitrary>], iteration_bounds = array<i64: 2, 1>, scalar_prefetch = 0 : i64, scratch_operands = 0 : i64, tpu.core_type = #tpu.core_type<tc>, window_params = [{transform_indices = @transform_0, window_bounds = array<i64: 16, 64>}, {pipeline_mode = #tpu.pipeline_mode<synchronous>, transform_indices = @transform_1, window_bounds = array<i64: 64, 512>}, {transform_indices = @transform_2, window_bounds = array<i64: 1, 8, 512>}, {transform_indices = @transform_3, window_bounds = array<i64: 1, 8, 512>}]} {
    %c0_i32 = arith.constant 0 : i32
    %0 = arith.cmpi eq, %arg1, %c0_i32 : i32
    %1 = arith.extui %0 : i1 to i32
    %c0_i32_0 = arith.constant 0 : i32
    %2 = arith.cmpi ne, %1, %c0_i32_0 : i32
    scf.if %2 {
      %cst_18 = arith.constant 0.000000e+00 : f32
      %22 = vector.broadcast %cst_18 : f32 to vector<8x512xf32>
      %c0_19 = arith.constant 0 : index
      %c0_20 = arith.constant 0 : index
      %c0_21 = arith.constant 0 : index
      %23 = vector.load %arg4[%c0_19, %c0_20, %c0_21] : memref<1x8x512xf32, #tpu.memory_space<vmem>>, vector<1x8x512xf32>
      %24 = vector.shape_cast %23 : vector<1x8x512xf32> to vector<8x512xf32>
      %25 = vector.shape_cast %22 : vector<8x512xf32> to vector<1x8x512xf32>
      tpu.vector_store %arg4[%c0_19, %c0_20, %c0_21], %25 {strides = array<i32>} : memref<1x8x512xf32, #tpu.memory_space<vmem>>, vector<1x8x512xf32>,
      %cst_22 = arith.constant 0.000000e+00 : f32
      %26 = vector.broadcast %cst_22 : f32 to vector<8x512xf32>
      %c0_23 = arith.constant 0 : index
      %c0_24 = arith.constant 0 : index
      %c0_25 = arith.constant 0 : index
      %27 = vector.load %arg5[%c0_23, %c0_24, %c0_25] : memref<1x8x512xf32, #tpu.memory_space<vmem>>, vector<1x8x512xf32>
      %28 = vector.shape_cast %27 : vector<1x8x512xf32> to vector<8x512xf32>
      %29 = vector.shape_cast %26 : vector<8x512xf32> to vector<1x8x512xf32>
      tpu.vector_store %arg5[%c0_23, %c0_24, %c0_25], %29 {strides = array<i32>} : memref<1x8x512xf32, #tpu.memory_space<vmem>>, vector<1x8x512xf32>,
    } else {
    }
    %c0 = arith.constant 0 : index
    %c0_1 = arith.constant 0 : index
    %3 = vector.load %arg2[%c0, %c0_1] : memref<16x64xf32, #tpu.memory_space<vmem>>, vector<16x64xf32>
    %c0_2 = arith.constant 0 : index
    %c0_3 = arith.constant 0 : index
    %4 = vector.load %arg3[%c0_2, %c0_3] : memref<64x512xf32, #tpu.memory_space<vmem>>, vector<64x512xf32>
    %cst = arith.constant dense<0.000000e+00> : vector<16x512xf32>
    %5 = tpu.matmul %3, %4, %cst {dimension_numbers = #tpu.dot_dimension_numbers<[1], [0], [0], [1], [0, 0, 1, 1], [], []>} : vector<16x64xf32>, vector<64x512xf32>, vector<16x512xf32> -> vector<16x512xf32>
    %6 = vector.shape_cast %5 : vector<16x512xf32> to vector<2x8x512xf32>
    %c0_4 = arith.constant 0 : index
    %c0_5 = arith.constant 0 : index
    %c0_6 = arith.constant 0 : index
    %7 = vector.load %arg4[%c0_4, %c0_5, %c0_6] : memref<1x8x512xf32, #tpu.memory_space<vmem>>, vector<1x8x512xf32>
    %8 = vector.shape_cast %7 : vector<1x8x512xf32> to vector<8x512xf32>
    %cst_7 = arith.constant dense<0.000000e+00> : vector<8x512xf32>
    %9 = vector.multi_reduction <add>, %6, %cst_7 [0] : vector<2x8x512xf32> to vector<8x512xf32>
    %10 = arith.addf %8, %9 : vector<8x512xf32>
    %c0_8 = arith.constant 0 : index
    %c0_9 = arith.constant 0 : index
    %c0_10 = arith.constant 0 : index
    %11 = vector.load %arg4[%c0_8, %c0_9, %c0_10] : memref<1x8x512xf32, #tpu.memory_space<vmem>>, vector<1x8x512xf32>
    %12 = vector.shape_cast %11 : vector<1x8x512xf32> to vector<8x512xf32>
    %13 = vector.shape_cast %10 : vector<8x512xf32> to vector<1x8x512xf32>
    tpu.vector_store %arg4[%c0_8, %c0_9, %c0_10], %13 {strides = array<i32>} : memref<1x8x512xf32, #tpu.memory_space<vmem>>, vector<1x8x512xf32>,
    %c0_11 = arith.constant 0 : index
    %c0_12 = arith.constant 0 : index
    %c0_13 = arith.constant 0 : index
    %14 = vector.load %arg5[%c0_11, %c0_12, %c0_13] : memref<1x8x512xf32, #tpu.memory_space<vmem>>, vector<1x8x512xf32>
    %15 = vector.shape_cast %14 : vector<1x8x512xf32> to vector<8x512xf32>
    %16 = arith.mulf %6, %6 : vector<2x8x512xf32>
    %cst_14 = arith.constant dense<0.000000e+00> : vector<8x512xf32>
    %17 = vector.multi_reduction <add>, %16, %cst_14 [0] : vector<2x8x512xf32> to vector<8x512xf32>
    %18 = arith.addf %15, %17 : vector<8x512xf32>
    %c0_15 = arith.constant 0 : index
    %c0_16 = arith.constant 0 : index
    %c0_17 = arith.constant 0 : index
    %19 = vector.load %arg5[%c0_15, %c0_16, %c0_17] : memref<1x8x512xf32, #tpu.memory_space<vmem>>, vector<1x8x512xf32>
    %20 = vector.shape_cast %19 : vector<1x8x512xf32> to vector<8x512xf32>
    %21 = vector.shape_cast %18 : vector<8x512xf32> to vector<1x8x512xf32>
    tpu.vector_store %arg5[%c0_15, %c0_16, %c0_17], %21 {strides = array<i32>} : memref<1x8x512xf32, #tpu.memory_space<vmem>>, vector<1x8x512xf32>,
    return
  }
  func.func @transform_0(%arg0: i32, %arg1: i32) -> (i32, i32) {
    %c1_i32 = arith.constant 1 : i32
    %0 = arith.muli %arg0, %c1_i32 : i32
    %1 = arith.addi %0, %arg1 : i32
    %c0_i32 = arith.constant 0 : i32
    %c0_i32_0 = arith.constant 0 : i32
    return %1, %c0_i32 : i32, i32
  }
  func.func @transform_1(%arg0: i32, %arg1: i32) -> (i32, i32) {
    %c0_i32 = arith.constant 0 : i32
    %c0_i32_0 = arith.constant 0 : i32
    %c0_i32_1 = arith.constant 0 : i32
    return %c0_i32, %c0_i32_0 : i32, i32
  }
  func.func @transform_2(%arg0: i32, %arg1: i32) -> (i32, i32, i32) {
    %c0_i32 = arith.constant 0 : i32
    %c0_i32_0 = arith.constant 0 : i32
    %c0_i32_1 = arith.constant 0 : i32
    return %arg0, %c0_i32, %c0_i32_0 : i32, i32, i32
  }
  func.func @transform_3(%arg0: i32, %arg1: i32) -> (i32, i32, i32) {
    %c0_i32 = arith.constant 0 : i32
    %c0_i32_0 = arith.constant 0 : i32
    %c0_i32_1 = arith.constant 0 : i32
    return %arg0, %c0_i32, %c0_i32_0 : i32, i32, i32
  }
}

module attributes {stable_mosaic.version = 11 : i64} {
  func.func @kernel(%arg0: i32, %arg1: i32, %arg2: memref<16x64xf32, #tpu.memory_space<vmem>>, %arg3: memref<64x512xf32, #tpu.memory_space<vmem>>, %arg4: memref<1x512xf32, #tpu.memory_space<vmem>>, %arg5: memref<1x512xf32, #tpu.memory_space<vmem>>, %arg6: memref<512x128xf32, #tpu.memory_space<vmem>>, %arg7: memref<16x128xf32, #tpu.memory_space<vmem>>, %arg8: memref<1x8x128xf32, #tpu.memory_space<vmem>>, %arg9: memref<1x8x128xf32, #tpu.memory_space<vmem>>) attributes {dimension_semantics = [#tpu.dimension_semantics<parallel>, #tpu.dimension_semantics<arbitrary>], iteration_bounds = array<i64: 2, 1>, scalar_prefetch = 0 : i64, scratch_operands = 0 : i64, tpu.core_type = #tpu.core_type<tc>, window_params = [{transform_indices = @transform_0, window_bounds = array<i64: 16, 64>}, {pipeline_mode = #tpu.pipeline_mode<synchronous>, transform_indices = @transform_1, window_bounds = array<i64: 64, 512>}, {pipeline_mode = #tpu.pipeline_mode<synchronous>, transform_indices = @transform_2, window_bounds = array<i64: 1, 512>}, {pipeline_mode = #tpu.pipeline_mode<synchronous>, transform_indices = @transform_3, window_bounds = array<i64: 1, 512>}, {pipeline_mode = #tpu.pipeline_mode<synchronous>, transform_indices = @transform_4, window_bounds = array<i64: 512, 128>}, {transform_indices = @transform_5, window_bounds = array<i64: 16, 128>}, {transform_indices = @transform_6, window_bounds = array<i64: 1, 8, 128>}, {transform_indices = @transform_7, window_bounds = array<i64: 1, 8, 128>}]} {
    %c0_i32 = arith.constant 0 : i32
    %0 = arith.cmpi eq, %arg1, %c0_i32 : i32
    %1 = arith.extui %0 : i1 to i32
    %c0_i32_0 = arith.constant 0 : i32
    %2 = arith.cmpi ne, %1, %c0_i32_0 : i32
    scf.if %2 {
      %cst_29 = arith.constant 0.000000e+00 : f32
      %43 = vector.broadcast %cst_29 : f32 to vector<8x128xf32>
      %c0_30 = arith.constant 0 : index
      %c0_31 = arith.constant 0 : index
      %c0_32 = arith.constant 0 : index
      %44 = vector.load %arg8[%c0_30, %c0_31, %c0_32] : memref<1x8x128xf32, #tpu.memory_space<vmem>>, vector<1x8x128xf32>
      %45 = vector.shape_cast %44 : vector<1x8x128xf32> to vector<8x128xf32>
      %46 = vector.shape_cast %43 : vector<8x128xf32> to vector<1x8x128xf32>
      tpu.vector_store %arg8[%c0_30, %c0_31, %c0_32], %46 {strides = array<i32>} : memref<1x8x128xf32, #tpu.memory_space<vmem>>, vector<1x8x128xf32>,
      %cst_33 = arith.constant 0.000000e+00 : f32
      %47 = vector.broadcast %cst_33 : f32 to vector<8x128xf32>
      %c0_34 = arith.constant 0 : index
      %c0_35 = arith.constant 0 : index
      %c0_36 = arith.constant 0 : index
      %48 = vector.load %arg9[%c0_34, %c0_35, %c0_36] : memref<1x8x128xf32, #tpu.memory_space<vmem>>, vector<1x8x128xf32>
      %49 = vector.shape_cast %48 : vector<1x8x128xf32> to vector<8x128xf32>
      %50 = vector.shape_cast %47 : vector<8x128xf32> to vector<1x8x128xf32>
      tpu.vector_store %arg9[%c0_34, %c0_35, %c0_36], %50 {strides = array<i32>} : memref<1x8x128xf32, #tpu.memory_space<vmem>>, vector<1x8x128xf32>,
    } else {
    }
    %c0 = arith.constant 0 : index
    %c0_1 = arith.constant 0 : index
    %3 = vector.load %arg2[%c0, %c0_1] : memref<16x64xf32, #tpu.memory_space<vmem>>, vector<16x64xf32>
    %c0_2 = arith.constant 0 : index
    %c0_3 = arith.constant 0 : index
    %4 = vector.load %arg3[%c0_2, %c0_3] : memref<64x512xf32, #tpu.memory_space<vmem>>, vector<64x512xf32>
    %cst = arith.constant dense<0.000000e+00> : vector<16x512xf32>
    %5 = tpu.matmul %3, %4, %cst {dimension_numbers = #tpu.dot_dimension_numbers<[1], [0], [0], [1], [0, 0, 1, 1], [], []>} : vector<16x64xf32>, vector<64x512xf32>, vector<16x512xf32> -> vector<16x512xf32>
    %c0_4 = arith.constant 0 : index
    %c0_5 = arith.constant 0 : index
    %6 = vector.load %arg4[%c0_4, %c0_5] : memref<1x512xf32, #tpu.memory_space<vmem>>, vector<1x512xf32>
    %7 = vector.broadcast %6 : vector<1x512xf32> to vector<16x512xf32>
    %8 = arith.mulf %5, %7 : vector<16x512xf32>
    %c0_6 = arith.constant 0 : index
    %c0_7 = arith.constant 0 : index
    %9 = vector.load %arg5[%c0_6, %c0_7] : memref<1x512xf32, #tpu.memory_space<vmem>>, vector<1x512xf32>
    %10 = vector.broadcast %9 : vector<1x512xf32> to vector<16x512xf32>
    %11 = arith.addf %8, %10 : vector<16x512xf32>
    %cst_8 = arith.constant 0.000000e+00 : f32
    %12 = vector.broadcast %cst_8 : f32 to vector<16x512xf32>
    %13 = arith.maximumf %11, %12 : vector<16x512xf32>
    %c0_9 = arith.constant 0 : index
    %c0_10 = arith.constant 0 : index
    %14 = vector.load %arg6[%c0_9, %c0_10] : memref<512x128xf32, #tpu.memory_space<vmem>>, vector<512x128xf32>
    %cst_11 = arith.constant dense<0.000000e+00> : vector<16x128xf32>
    %15 = tpu.matmul %13, %14, %cst_11 {dimension_numbers = #tpu.dot_dimension_numbers<[1], [0], [0], [1], [0, 0, 1, 1], [], []>} : vector<16x512xf32>, vector<512x128xf32>, vector<16x128xf32> -> vector<16x128xf32>
    %c0_12 = arith.constant 0 : index
    %c0_13 = arith.constant 0 : index
    %16 = vector.load %arg7[%c0_12, %c0_13] : memref<16x128xf32, #tpu.memory_space<vmem>>, vector<16x128xf32>
    tpu.vector_store %arg7[%c0_12, %c0_13], %15 {strides = array<i32>} : memref<16x128xf32, #tpu.memory_space<vmem>>, vector<16x128xf32>,
    %c1_i32 = arith.constant 1 : i32
    %17 = arith.muli %arg0, %c1_i32 : i32
    %18 = arith.addi %17, %arg1 : i32
    %c16_i32 = arith.constant 16 : i32
    %19 = arith.muli %18, %c16_i32 : i32
    %20 = tpu.iota {dimensions = array<i32: 0>} : vector<16x128xi32>
    %21 = vector.broadcast %19 : i32 to vector<16x128xi32>
    %22 = arith.addi %21, %20 : vector<16x128xi32>
    %c24_i32 = arith.constant 24 : i32
    %23 = vector.broadcast %c24_i32 : i32 to vector<16x128xi32>
    %24 = arith.cmpi slt, %22, %23 : vector<16x128xi32>
    %cst_14 = arith.constant 0.000000e+00 : f32
    %25 = vector.broadcast %cst_14 : f32 to vector<16x128xf32>
    %26 = arith.select %24, %15, %25 : vector<16x128xi1>, vector<16x128xf32>
    %27 = vector.shape_cast %26 : vector<16x128xf32> to vector<2x8x128xf32>
    %c0_15 = arith.constant 0 : index
    %c0_16 = arith.constant 0 : index
    %c0_17 = arith.constant 0 : index
    %28 = vector.load %arg8[%c0_15, %c0_16, %c0_17] : memref<1x8x128xf32, #tpu.memory_space<vmem>>, vector<1x8x128xf32>
    %29 = vector.shape_cast %28 : vector<1x8x128xf32> to vector<8x128xf32>
    %cst_18 = arith.constant dense<0.000000e+00> : vector<8x128xf32>
    %30 = vector.multi_reduction <add>, %27, %cst_18 [0] : vector<2x8x128xf32> to vector<8x128xf32>
    %31 = arith.addf %29, %30 : vector<8x128xf32>
    %c0_19 = arith.constant 0 : index
    %c0_20 = arith.constant 0 : index
    %c0_21 = arith.constant 0 : index
    %32 = vector.load %arg8[%c0_19, %c0_20, %c0_21] : memref<1x8x128xf32, #tpu.memory_space<vmem>>, vector<1x8x128xf32>
    %33 = vector.shape_cast %32 : vector<1x8x128xf32> to vector<8x128xf32>
    %34 = vector.shape_cast %31 : vector<8x128xf32> to vector<1x8x128xf32>
    tpu.vector_store %arg8[%c0_19, %c0_20, %c0_21], %34 {strides = array<i32>} : memref<1x8x128xf32, #tpu.memory_space<vmem>>, vector<1x8x128xf32>,
    %c0_22 = arith.constant 0 : index
    %c0_23 = arith.constant 0 : index
    %c0_24 = arith.constant 0 : index
    %35 = vector.load %arg9[%c0_22, %c0_23, %c0_24] : memref<1x8x128xf32, #tpu.memory_space<vmem>>, vector<1x8x128xf32>
    %36 = vector.shape_cast %35 : vector<1x8x128xf32> to vector<8x128xf32>
    %37 = arith.mulf %27, %27 : vector<2x8x128xf32>
    %cst_25 = arith.constant dense<0.000000e+00> : vector<8x128xf32>
    %38 = vector.multi_reduction <add>, %37, %cst_25 [0] : vector<2x8x128xf32> to vector<8x128xf32>
    %39 = arith.addf %36, %38 : vector<8x128xf32>
    %c0_26 = arith.constant 0 : index
    %c0_27 = arith.constant 0 : index
    %c0_28 = arith.constant 0 : index
    %40 = vector.load %arg9[%c0_26, %c0_27, %c0_28] : memref<1x8x128xf32, #tpu.memory_space<vmem>>, vector<1x8x128xf32>
    %41 = vector.shape_cast %40 : vector<1x8x128xf32> to vector<8x128xf32>
    %42 = vector.shape_cast %39 : vector<8x128xf32> to vector<1x8x128xf32>
    tpu.vector_store %arg9[%c0_26, %c0_27, %c0_28], %42 {strides = array<i32>} : memref<1x8x128xf32, #tpu.memory_space<vmem>>, vector<1x8x128xf32>,
    return
  }
  func.func @transform_0(%arg0: i32, %arg1: i32) -> (i32, i32) {
    %c1_i32 = arith.constant 1 : i32
    %0 = arith.muli %arg0, %c1_i32 : i32
    %1 = arith.addi %0, %arg1 : i32
    %c0_i32 = arith.constant 0 : i32
    %c0_i32_0 = arith.constant 0 : i32
    return %1, %c0_i32 : i32, i32
  }
  func.func @transform_1(%arg0: i32, %arg1: i32) -> (i32, i32) {
    %c0_i32 = arith.constant 0 : i32
    %c0_i32_0 = arith.constant 0 : i32
    %c0_i32_1 = arith.constant 0 : i32
    return %c0_i32, %c0_i32_0 : i32, i32
  }
  func.func @transform_2(%arg0: i32, %arg1: i32) -> (i32, i32) {
    %c0_i32 = arith.constant 0 : i32
    %c0_i32_0 = arith.constant 0 : i32
    %c0_i32_1 = arith.constant 0 : i32
    return %c0_i32, %c0_i32_0 : i32, i32
  }
  func.func @transform_3(%arg0: i32, %arg1: i32) -> (i32, i32) {
    %c0_i32 = arith.constant 0 : i32
    %c0_i32_0 = arith.constant 0 : i32
    %c0_i32_1 = arith.constant 0 : i32
    return %c0_i32, %c0_i32_0 : i32, i32
  }
  func.func @transform_4(%arg0: i32, %arg1: i32) -> (i32, i32) {
    %c0_i32 = arith.constant 0 : i32
    %c0_i32_0 = arith.constant 0 : i32
    %c0_i32_1 = arith.constant 0 : i32
    return %c0_i32, %c0_i32_0 : i32, i32
  }
  func.func @transform_5(%arg0: i32, %arg1: i32) -> (i32, i32) {
    %c1_i32 = arith.constant 1 : i32
    %0 = arith.muli %arg0, %c1_i32 : i32
    %1 = arith.addi %0, %arg1 : i32
    %c0_i32 = arith.constant 0 : i32
    %c0_i32_0 = arith.constant 0 : i32
    return %1, %c0_i32 : i32, i32
  }
  func.func @transform_6(%arg0: i32, %arg1: i32) -> (i32, i32, i32) {
    %c0_i32 = arith.constant 0 : i32
    %c0_i32_0 = arith.constant 0 : i32
    %c0_i32_1 = arith.constant 0 : i32
    return %arg0, %c0_i32, %c0_i32_0 : i32, i32, i32
  }
  func.func @transform_7(%arg0: i32, %arg1: i32) -> (i32, i32, i32) {
    %c0_i32 = arith.constant 0 : i32
    %c0_i32_0 = arith.constant 0 : i32
    %c0_i32_1 = arith.constant 0 : i32
    return %arg0, %c0_i32, %c0_i32_0 : i32, i32, i32
  }
}

</mosaic_0001>

<bundles_post_ra>
// kernel: parametric_umap_forward.2
= control target key start
LH: loop header
LB: loop body
LE: loop exit
PB: predicated region body
PF: predicated region fallthrough
CT: control target
= control target key end

     0   :  { %9 = vsyncpa [#allocation3], 0  ;;  %s747_s12 = smov 0   ;;  %s749_s13 = smov 0   ;;  %s841_s0 = inlined_call_operand.vmem [shape: f32[32,64], index: 0, kind: input, shape index: {}]   ;;  %s842_s1 = inlined_call_operand.hbm [shape: f32[64,512], index: 1, kind: input, shape index: {}]   ;;  %s843_s2 = inlined_call_operand.vmem [shape: f32[2,8,512], index: 2, kind: output, shape index: {0}]   ;;  %s844_s3 = inlined_call_operand.vmem [shape: f32[2,8,512], index: 3, kind: output, shape index: {1}]  }
   0x1   :  { %s751_s14 = smov 0  }
   0x2 LB: > { %s576_s15 = sadd.s32 4294967295, %s721_s14   ;;  %s27_s16 = sadd.s32 1, %s717_s13  ;;  %s721_s14 = sphi %s751_s14, %s15_s14   ;;  %s717_s13 = sphi %s749_s13, %s855_s13   ;;  %s713_s12 = sphi %s747_s12, %s854_s12  }
   0x3   : > { %p29_p0 = scmp.ge.s32.totalorder %s27_s16, 2  ;;  %p578_p1 = scmp.ge.s32.totalorder %s721_s14, 1 }
   0x4   : > { %p133_p2 = scmp.lt.s32.totalorder %s721_s14, 3  ;;  %p772_p4 = scmp.eq.s32.totalorder %s576_s15, 0 }
   0x5   : > { %s857_s16 = smov (%p29_p0, %s27_s16), 0  ;;  %s723_s19 = smov [#allocation2]  }
   0x6   : > { %p768_p3 = pnand %p578_p1, %p133_p2  ;;  %s145_s20 = sshll.u32 %s723_s19, 4  ;;  %s146_s20 = int_to_ptr.vmem [resolvable:$true] %s145_s20 }
   0x7   : > { %s849_s18 = scalar_select %p772_p4, 1, 0 }
   0x8   : > { %s848_s17 = scalar_select %p768_p3, 1, 0 }
   0x9   : > { %p633_p5 = pneg %p768_p3  ;;  %s667_s24 = scalar_lea.hbm %s842_s1, 4096 }
   0xa   : > { %p668_p7 = scmp.ne.s32.totalorder %s842_s1, %s667_s24  ;;  %p674_p11 = scmp.lt.u32.totalorder %s667_s24, %s842_s1 }
   0xb   : > { %p780_p6 = pnand %p772_p4, %p633_p5 }
   0xd   : > { %p669_p8 = pneg %p780_p6 }
   0xf   : > { %p670_p9 = pnand %p669_p8, %p668_p7 }
  0x11   : > { %p671_p10 = pneg %p670_p9 }
  0x13   : > { %p676_p12 = pnand %p674_p11, %p671_p10 }
  0x15   : > { %679 = shalt.err (!%p676_p12)
}
  0x16   : > { %s680_s29 = scalar_lea.vmem %s146_s20, 4096  ;;  %p688_p2 = scmp.lt.s32.totalorder %s146_s20, %s146_s20 }
  0x17   : > { %p681_p13 = scmp.ne.s32.totalorder %s146_s20, %s680_s29  ;;  %p689_p5 = scmp.lt.s32.totalorder %s680_s29, %s680_s29 }
  0x19   : > { %p683_p0 = pnand %p681_p13, %p669_p8  ;;  %p690_p4 = por %p689_p5, %p688_p2 }
  0x1b   : > { %p684_p1 = pneg %p683_p0 }
  0x1d   : > { %p691_p3 = pnand %p690_p4, %p684_p1 }
  0x1f   : > { %694 = shalt.err (!%p691_p3)
}
  0x20   : > { %s724_s30 = smov 512   ;;  %s725_s4 = smov 32  }
  0x21   : > { %636 = dma.hbm_to_vmem [thread:$0]  (!%p780_p6), %s842_s1, 4096, %s146_s20, [#allocation3], %s724_s30, %s724_s30, %s725_s4  }
  0x22   : > { %p851_p7 = scmp.ne.s32.totalorder %s848_s17, 0 }
  0x23   : > { %p852_p9 = scmp.ne.s32.totalorder (!%p851_p7), %s849_s18, 0 }
  0x24   : > { %172 = sbr.rel (%p851_p7) target bundleno = 287 (0x11f), region = 28 }
  0x2b   : > { %708 = dma.done.wait (%p852_p9), [#allocation3], 4096  }
  0x2c   : > { %710 = vsyncadd (%p852_p9), [#allocation3], 4294963200  ;;  %v726_v0 = vmov 0.0   ;;  %s583_s7 = sshll.u32 %s713_s12, 1  ;;  %v235_v1 = vld [vmem:[#allocation2 + $0x8] sm:$0xff]  ;;  %v237_v3 = vld [vmem:[#allocation2 + $0x18] sm:$0xff] }
  0x2d   : > { %337 = vmatprep.mubr.f32.mxu0 %v726_v0  ;;  %414 = vmatprep.mubr.f32.mxu1 %v726_v0  ;;  %v239_v2 = vld [vmem:[#allocation2 + $0x28] sm:$0xff]  ;;  %v241_v5 = vld [vmem:[#allocation2 + $0x38] sm:$0xff]  ;;  %v234_v6 = vld [vmem:[#allocation2] sm:$0xff]  ;;  %p811_p3 = scmp.lt.s32.totalorder %s583_s7, 3  ;;  %vm266_vm0 = vcmask 523264   ;;  %p210_p4 = scmp.lt.s32.totalorder %s713_s12, 1 }
  0x2e   : > { %v597_v4 = vpack.c.bf16 %v239_v2, %v235_v1  ;;  %v238_v7 = vld [vmem:[#allocation2 + $0x20] sm:$0xff]  ;;  %v613_v8 = vpack.c.bf16 %v241_v5, %v237_v3  ;;  %v236_v10 = vld [vmem:[#allocation2 + $0x10] sm:$0xff]  ;;  %v243_v12 = vld [vmem:[#allocation2 + $0x48] sm:$0xff] }
  0x2f   : > { %v599_v9 = vpack.c.bf16 %v238_v7, %v234_v6  ;;  %v240_v11 = vld [vmem:[#allocation2 + $0x30] sm:$0xff]  ;;  %v247_v14 = vld [vmem:[#allocation2 + $0x68] sm:$0xff]  ;;  %v245_v15 = vld [vmem:[#allocation2 + $0x58] sm:$0xff]  ;;  %s859_s7 = smov (!%p811_p3, %s583_s7), 3  ;;  %s861_s12 = smov (!%p210_p4, %s713_s12), 1 }
  0x30   : > { %598 = vmatprep.subr.bf16.mxu0 %v597_v4  ;;  %v615_v13 = vpack.c.bf16 %v240_v11, %v236_v10  ;;  %v249_v16 = vld [vmem:[#allocation2 + $0x78] sm:$0xff]  ;;  %614 = vmatprep.subr.bf16.mxu1 %v613_v8  ;;  %v601_v17 = vpack.c.bf16 %v247_v14, %v243_v12  ;;  %v242_v19 = vld [vmem:[#allocation2 + $0x40] sm:$0xff]  ;;  %v244_v21 = vld [vmem:[#allocation2 + $0x50] sm:$0xff]  ;;  %s584_s9 = sshll.u32 %s859_s7, 3  ;;  %s595_s17 = sshll.u32 %s861_s12, 5 }
  0x31   : > { %600 = vmatpush1.bf16.msra.mxu0 %v599_v9  ;;  %v617_v18 = vpack.c.bf16 %v249_v16, %v245_v15  ;;  %v246_v20 = vld [vmem:[#allocation2 + $0x60] sm:$0xff]  ;;  %v248_v23 = vld [vmem:[#allocation2 + $0x70] sm:$0xff]  ;;  %v251_v24 = vld [vmem:[#allocation2 + $0x88] sm:$0xff]  ;;  %s207_s15 = scalar_lea.vmem %s841_s0, %s584_s9  ;;  %s214_s20 = scalar_lea.vmem %s843_s2, %s595_s17 }
  0x32   : > { %616 = vmatpush1.bf16.msra.mxu1 %v615_v13  ;;  %v603_v22 = vpack.c.bf16 %v246_v20, %v242_v19  ;;  %v255_v25 = vld [vmem:[#allocation2 + $0xa8] sm:$0xff]  ;;  %602 = vmatprep.subr.bf16.mxu0 %v601_v17  ;;  %v619_v26 = vpack.c.bf16 %v248_v23, %v244_v21  ;;  %v253_v28 = vld [vmem:[#allocation2 + $0x98] sm:$0xff]  ;;  %v250_v30 = vld [vmem:[#allocation2 + $0x80] sm:$0xff]  ;;  %s219_s22 = scalar_lea.vmem %s844_s3, %s595_s17 }
  0x33   : > { %618 = vmatprep.subr.bf16.mxu1 %v617_v18  ;;  %v605_v27 = vpack.c.bf16 %v255_v25, %v251_v24  ;;  %v257_v29 = vld [vmem:[#allocation2 + $0xb8] sm:$0xff]  ;;  %v254_v32 = vld [vmem:[#allocation2 + $0xa0] sm:$0xff]  ;;  %v252_v33 = vld [vmem:[#allocation2 + $0x90] sm:$0xff] }
  0x34   : > { %v621_v31 = vpack.c.bf16 %v257_v29, %v253_v28  ;;  %v256_v34 = vld [vmem:[#allocation2 + $0xb0] sm:$0xff]  ;;  %v607_v35 = vpack.c.bf16 %v254_v32, %v250_v30  ;;  %v259_v36 = vld [vmem:[#allocation2 + $0xc8] sm:$0xff]  ;;  %v261_v38 = vld [vmem:[#allocation2 + $0xd8] sm:$0xff] }
  0x35   : > { %604 = vmatpush1.bf16.msra.mxu0 %v603_v22  ;;  %v263_v37 = vld [vmem:[#allocation2 + $0xe8] sm:$0xff]  ;;  %v623_v39 = vpack.c.bf16 %v256_v34, %v252_v33  ;;  %v265_v41 = vld [vmem:[#allocation2 + $0xf8] sm:$0xff]  ;;  %v258_v42 = vld [vmem:[#allocation2 + $0xc0] sm:$0xff] }
  0x36   : > { %620 = vmatpush1.bf16.msra.mxu1 %v619_v26  ;;  %606 = vmatprep.subr.bf16.mxu0 %v605_v27  ;;  %v609_v40 = vpack.c.bf16 %v263_v37, %v259_v36  ;;  %v262_v43 = vld [vmem:[#allocation2 + $0xe0] sm:$0xff]  ;;  %v625_v44 = vpack.c.bf16 %v265_v41, %v261_v38  ;;  %v260_v45 = vld [vmem:[#allocation2 + $0xd0] sm:$0xff]  ;;  %v233_v50 = vld [vmem:[%s207_s15 + $0x8] sm:$0xff] }
  0x37   : > { %622 = vmatprep.subr.bf16.mxu1 %v621_v31  ;;  %v264_v46 = vld [vmem:[#allocation2 + $0xf0] sm:$0xff]  ;;  %v611_v47 = vpack.c.bf16 %v262_v43, %v258_v42  ;;  %v232_v49 = vld [vmem:[%s207_s15] sm:$0xff] }
  0x38   : > { %v627_v48 = vpack.c.bf16 %v264_v46, %v260_v45 }
  0x39   : > { %608 = vmatpush1.bf16.msra.mxu0 %v607_v35 }
  0x3a   : > { %624 = vmatpush1.bf16.msra.mxu1 %v623_v39  ;;  %610 = vmatprep.subr.bf16.mxu0 %v609_v40 }
  0x3b   : > { %626 = vmatprep.subr.bf16.mxu1 %v625_v44 }
  0x3d   : > { %612 = vmatpush1.bf16.msra.mxu0 %v611_v47 }
  0x3e   : > { %628 = vmatpush1.bf16.msra.mxu1 %v627_v48 }
  0x40   : > { %589 = vmatmul.mubr.msk.f32.vlgmr.msra.gmra.mrb[0].mxu0 %vm266_vm0, %v232_v49 }
  0x41   : > { %591 = vmatmul.mubr.msk.f32.vlgmr.msra.gmra.mrb[0].mxu1 %vm266_vm0, %v232_v49  ;;  %343 = vmatprep.mubr.f32.mxu0 %v726_v0 }
  0x42   : > { %420 = vmatprep.mubr.f32.mxu1 %v726_v0 }
  0x44   : > { %590 = vmatmul.mubr.msk.f32.gmra.mrb[2].mxu0 %vm266_vm0, %v233_v50 }
  0x45   : > { %592 = vmatmul.mubr.msk.f32.gmra.mrb[2].mxu1 %vm266_vm0, %v233_v50 }
 0x113   : > { %v339_v51 = vpop.f32.mrb[0].mxu0 }
 0x114   : > { %v416_v52 = vpop.f32.mrb[0].mxu1  ;;  %v341_v53 = vpop.f32.mrb[1].mxu0  ;;  %v447_v55 = vmul.f32 %v339_v51, %v339_v51 }
 0x115   : > { %v418_v54 = vpop.f32.mrb[1].mxu1  ;;  %v449_v56 = vmul.f32 %v416_v52, %v416_v52  ;;  %v448_v58 = vmul.f32 %v341_v53, %v341_v53 }
 0x116   : > { %v450_v59 = vmul.f32 %v418_v54, %v418_v54 }
 0x117   : > { %v345_v57 = vpop.f32.mrb[2].mxu0 }
 0x118   : > { %v431_v60 = vadd.f32 %v345_v57, %v339_v51  ;;  %v451_v61 = vmul.f32 %v345_v57, %v345_v57  ;;  %v422_v62 = vpop.f32.mrb[2].mxu1  ;;  %v347_v63 = vpop.f32.mrb[3].mxu0 }
 0x119   : > { %v433_v0 = vadd.f32 %v422_v62, %v416_v52  ;;  %v453_v1 = vmul.f32 %v422_v62, %v422_v62  ;;  %v432_v2 = vadd.f32 %v347_v63, %v341_v53  ;;  %v452_v3 = vmul.f32 %v347_v63, %v347_v63  ;;  %v424_v4 = vpop.f32.mrb[3].mxu1 }
 0x11a   : > { %v455_v5 = vadd.f32 %v451_v61, %v447_v55  ;;  %v434_v6 = vadd.f32 %v424_v4, %v418_v54  ;;  %v454_v7 = vmul.f32 %v424_v4, %v424_v4  ;;  %439 = vst [vmem:[%s214_s20] sm:$0xff] %v431_v60 }
 0x11b   : > { %v457_v8 = vadd.f32 %v453_v1, %v449_v56  ;;  %v456_v9 = vadd.f32 %v452_v3, %v448_v58  ;;  %441 = vst [vmem:[%s214_s20 + $0x10] sm:$0xff] %v433_v0  ;;  %440 = vst [vmem:[%s214_s20 + $0x8] sm:$0xff] %v432_v2 }
 0x11c   : > { %v458_v10 = vadd.f32 %v454_v7, %v450_v59  ;;  %463 = vst [vmem:[%s219_s22] sm:$0xff] %v455_v5  ;;  %442 = vst [vmem:[%s214_s20 + $0x18] sm:$0xff] %v434_v6 }
 0x11d   : > { %465 = vst [vmem:[%s219_s22 + $0x10] sm:$0xff] %v457_v8  ;;  %464 = vst [vmem:[%s219_s22 + $0x8] sm:$0xff] %v456_v9 }
 0x11e   : > { %466 = vst [vmem:[%s219_s22 + $0x18] sm:$0xff] %v458_v10 }
 0x11f PF: > { %s15_s14 = sadd.s32 1, %s721_s14   ;;  %s854_s12 = smov %s717_s13 }
 0x120   : > { %p12_p6 = scmp.ge.s32.totalorder %s15_s14, 4   ;;  %s855_s13 = smov %s857_s16 }
 0x122   :  { %14 = sbr.rel (!%p12_p6) target bundleno = 2 (0x2), region = 79 }
 0x129   :  { %504 = vsyncpa [#allocation3], 1 }
 0x12a   :  { %506 = vsyncpa [#allocation3 + $0x1], 1 }

// kernel: parametric_umap_forward.3
= control target key start
LH: loop header
LB: loop body
LE: loop exit
PB: predicated region body
PF: predicated region fallthrough
CT: control target
= control target key end

     0   :  { %s1244_s24 = smov 0   ;;  %s1246_s25 = smov 0   ;;  %s1620_s0 = inlined_call_operand.vmem [shape: f32[32,64], index: 0, kind: input, shape index: {}]   ;;  %s1621_s1 = inlined_call_operand.vmem [shape: f32[64,512], index: 1, kind: input, shape index: {}]   ;;  %s1622_s2 = inlined_call_operand.vmem [shape: f32[1,512], index: 2, kind: input, shape index: {}]   ;;  %s1623_s3 = inlined_call_operand.vmem [shape: f32[1,512], index: 3, kind: input, shape index: {}]   ;;  %s1624_s4 = inlined_call_operand.vmem [shape: f32[512,128], index: 4, kind: input, shape index: {}]   ;;  %s1625_s5 = inlined_call_operand.vmem [shape: f32[32,128], index: 5, kind: output, shape index: {0}]   ;;  %s1626_s6 = inlined_call_operand.vmem [shape: f32[2,8,128], index: 6, kind: output, shape index: {1}]   ;;  %s1627_s7 = inlined_call_operand.vmem [shape: f32[2,8,128], index: 7, kind: output, shape index: {2}]  }
   0x1   :  { %s1248_s26 = smov 0  }
   0x2 LB: > { %s30_s27 = sadd.s32 1, %s1197_s25  ;;  %p968_p0 = scmp.ge.s32.totalorder %s1201_s26, 1  ;;  %s1201_s26 = sphi %s1248_s26, %s18_s26   ;;  %s1197_s25 = sphi %s1246_s25, %s1630_s25   ;;  %s1193_s24 = sphi %s1244_s24, %s1629_s24  }
   0x3   : > { %p32_p1 = scmp.ge.s32.totalorder %s30_s27, 2  ;;  %p261_p2 = scmp.lt.s32.totalorder %s1201_s26, 3 }
   0x5   : > { %s1632_s27 = smov (%p32_p1, %s30_s27), 0  ;;  %p262_p3 = pnand %p968_p0, %p261_p2 }
   0x6   : > { %v336_v0 = vld [vmem:[%s1621_s1 + $0x8] sm:$0xff] (!%p262_p3)  ;;  %v338_v2 = vld [vmem:[%s1621_s1 + $0x18] sm:$0xff] (!%p262_p3)  ;;  %s969_s11 = sshll.u32 (!%p262_p3), %s1193_s24, 1  ;;  %v335_v5 = vld [vmem:[%s1621_s1] sm:$0xff] (!%p262_p3)  ;;  %v1203_v7 = vmov (!%p262_p3), 0.0   ;;  %vm367_vm0 = vcmask (!%p262_p3), 523264  }
   0x7   : > { %265 = sbr.rel (%p262_p3) target bundleno = 474 (0x1da), region = 40  ;;  %v340_v1 = vld [vmem:[%s1621_s1 + $0x28] sm:$0xff] (!%p262_p3)  ;;  %v342_v4 = vld [vmem:[%s1621_s1 + $0x38] sm:$0xff] (!%p262_p3)  ;;  %v339_v6 = vld [vmem:[%s1621_s1 + $0x20] sm:$0xff] (!%p262_p3)  ;;  %438 = vmatprep.mubr.f32.mxu0 (!%p262_p3), %v1203_v7  ;;  %515 = vmatprep.mubr.f32.mxu1 (!%p262_p3), %v1203_v7  ;;  %p1296_p4 = scmp.lt.s32.totalorder (!%p262_p3), %s969_s11, 3 }
   0x8   : > { %v1058_v3 = vpack.c.bf16 (!%p262_p3), %v340_v1, %v336_v0  ;;  %v1074_v8 = vpack.c.bf16 (!%p262_p3), %v342_v4, %v338_v2  ;;  %v1060_v9 = vpack.c.bf16 (!%p262_p3), %v339_v6, %v335_v5  ;;  %v337_v10 = vld [vmem:[%s1621_s1 + $0x10] sm:$0xff] (!%p262_p3)  ;;  %v344_v12 = vld [vmem:[%s1621_s1 + $0x48] sm:$0xff] (!%p262_p3)  ;;  %v346_v15 = vld [vmem:[%s1621_s1 + $0x58] sm:$0xff] (!%p262_p3)  ;;  %s979_s19 = sshll.u32 (!%p262_p3), %s1193_s24, 4  ;;  %p319_p5 = scmp.lt.s32.totalorder (!%p262_p3), %s1193_s24, 1 }
   0x9   : > { %v341_v11 = vld [vmem:[%s1621_s1 + $0x30] sm:$0xff] (!%p262_p3)  ;;  %v348_v14 = vld [vmem:[%s1621_s1 + $0x68] sm:$0xff] (!%p262_p3)  ;;  %v350_v16 = vld [vmem:[%s1621_s1 + $0x78] sm:$0xff] (!%p262_p3) }
   0xa   : > { %1059 = vmatprep.subr.bf16.mxu0 (!%p262_p3), %v1058_v3  ;;  %v1076_v13 = vpack.c.bf16 (!%p262_p3), %v341_v11, %v337_v10  ;;  %1075 = vmatprep.subr.bf16.mxu1 (!%p262_p3), %v1074_v8  ;;  %v1062_v17 = vpack.c.bf16 (!%p262_p3), %v348_v14, %v344_v12  ;;  %v1078_v18 = vpack.c.bf16 (!%p262_p3), %v350_v16, %v346_v15  ;;  %v343_v19 = vld [vmem:[%s1621_s1 + $0x40] sm:$0xff] (!%p262_p3)  ;;  %v345_v21 = vld [vmem:[%s1621_s1 + $0x50] sm:$0xff] (!%p262_p3)  ;;  %v352_v24 = vld [vmem:[%s1621_s1 + $0x88] sm:$0xff] (!%p262_p3) }
   0xb   : > { %1061 = vmatpush1.bf16.msra.mxu0 (!%p262_p3), %v1060_v9  ;;  %v347_v20 = vld [vmem:[%s1621_s1 + $0x60] sm:$0xff] (!%p262_p3)  ;;  %v349_v23 = vld [vmem:[%s1621_s1 + $0x70] sm:$0xff] (!%p262_p3)  ;;  %v356_v25 = vld [vmem:[%s1621_s1 + $0xa8] sm:$0xff] (!%p262_p3) }
   0xc   : > { %1077 = vmatpush1.bf16.msra.mxu1 (!%p262_p3), %v1076_v13  ;;  %v1064_v22 = vpack.c.bf16 (!%p262_p3), %v347_v20, %v343_v19  ;;  %1063 = vmatprep.subr.bf16.mxu0 (!%p262_p3), %v1062_v17  ;;  %v1080_v26 = vpack.c.bf16 (!%p262_p3), %v349_v23, %v345_v21  ;;  %v1066_v27 = vpack.c.bf16 (!%p262_p3), %v356_v25, %v352_v24  ;;  %v354_v28 = vld [vmem:[%s1621_s1 + $0x98] sm:$0xff] (!%p262_p3)  ;;  %v351_v30 = vld [vmem:[%s1621_s1 + $0x80] sm:$0xff] (!%p262_p3)  ;;  %v353_v33 = vld [vmem:[%s1621_s1 + $0x90] sm:$0xff] (!%p262_p3) }
   0xd   : > { %1079 = vmatprep.subr.bf16.mxu1 (!%p262_p3), %v1078_v18  ;;  %v358_v29 = vld [vmem:[%s1621_s1 + $0xb8] sm:$0xff] (!%p262_p3)  ;;  %v355_v32 = vld [vmem:[%s1621_s1 + $0xa0] sm:$0xff] (!%p262_p3)  ;;  %v357_v34 = vld [vmem:[%s1621_s1 + $0xb0] sm:$0xff] (!%p262_p3) }
   0xe   : > { %s1634_s11 = smov (!%p1296_p4, %s969_s11), 3  ;;  %v1082_v31 = vpack.c.bf16 %v358_v29, %v354_v28  ;;  %v1068_v35 = vpack.c.bf16 %v355_v32, %v351_v30  ;;  %v360_v36 = vld [vmem:[%s1621_s1 + $0xc8] sm:$0xff]  ;;  %v362_v38 = vld [vmem:[%s1621_s1 + $0xd8] sm:$0xff]  ;;  %v1084_v39 = vpack.c.bf16 %v357_v34, %v353_v33  ;;  %v359_v42 = vld [vmem:[%s1621_s1 + $0xc0] sm:$0xff]  ;;  %s1636_s24 = smov (!%p319_p5, %s1193_s24), 1 }
   0xf   : > { %1065 = vmatpush1.bf16.msra.mxu0 %v1064_v22  ;;  %v364_v37 = vld [vmem:[%s1621_s1 + $0xe8] sm:$0xff]  ;;  %v366_v41 = vld [vmem:[%s1621_s1 + $0xf8] sm:$0xff]  ;;  %v363_v43 = vld [vmem:[%s1621_s1 + $0xe0] sm:$0xff]  ;;  %s970_s18 = sshll.u32 %s1634_s11, 3  ;;  %s973_s22 = sshll.u32 %s1636_s24, 3 }
  0x10   : > { %1081 = vmatpush1.bf16.msra.mxu1 %v1080_v26  ;;  %1067 = vmatprep.subr.bf16.mxu0 %v1066_v27  ;;  %v1070_v40 = vpack.c.bf16 %v364_v37, %v360_v36  ;;  %v1086_v44 = vpack.c.bf16 %v366_v41, %v362_v38  ;;  %v361_v45 = vld [vmem:[%s1621_s1 + $0xd0] sm:$0xff]  ;;  %v612_v47 = vld [vmem:[%s1624_s4 + $0x80] sm:$0xff]  ;;  %v613_v48 = vld [vmem:[%s1624_s4 + $0x88] sm:$0xff]  ;;  %v1072_v49 = vpack.c.bf16 %v363_v43, %v359_v42  ;;  %s1393_s10 = scalar_lea.vmem %s1620_s0, %s970_s18  ;;  %s316_s21 = scalar_lea.vmem %s1625_s5, %s970_s18 }
  0x11   : > { %1083 = vmatprep.subr.bf16.mxu1 %v1082_v31  ;;  %v365_v46 = vld [vmem:[%s1621_s1 + $0xf0] sm:$0xff]  ;;  %v644_v50 = vld [vmem:[%s1624_s4 + $0x180] sm:$0xff]  ;;  %v645_v51 = vld [vmem:[%s1624_s4 + $0x188] sm:$0xff]  ;;  %v1090_v53 = vpack.c.bf16 %v613_v48, %v612_v47  ;;  %s322_s23 = scalar_lea.vmem %s1626_s6, %s973_s22  ;;  %s326_s8 = scalar_lea.vmem %s1627_s7, %s973_s22 }
  0x12   : > { %v1088_v52 = vpack.c.bf16 %v365_v46, %v361_v45  ;;  %v1122_v54 = vpack.c.bf16 %v645_v51, %v644_v50  ;;  %v596_v55 = vld [vmem:[%s1624_s4] sm:$0xff]  ;;  %v597_v56 = vld [vmem:[%s1624_s4 + $0x8] sm:$0xff]  ;;  %v614_v59 = vld [vmem:[%s1624_s4 + $0x90] sm:$0xff] }
  0x13   : > { %1069 = vmatpush1.bf16.msra.mxu0 %v1068_v35  ;;  %v628_v57 = vld [vmem:[%s1624_s4 + $0x100] sm:$0xff]  ;;  %v629_v58 = vld [vmem:[%s1624_s4 + $0x108] sm:$0xff]  ;;  %v615_v60 = vld [vmem:[%s1624_s4 + $0x98] sm:$0xff]  ;;  %v1092_v0 = vpack.c.bf16 %v597_v56, %v596_v55 }
  0x14   : > { %1085 = vmatpush1.bf16.msra.mxu1 %v1084_v39  ;;  %1071 = vmatprep.subr.bf16.mxu0 %v1070_v40  ;;  %v333_v61 = vld [vmem:[%s1393_s10] sm:$0xff]  ;;  %v646_v62 = vld [vmem:[%s1624_s4 + $0x190] sm:$0xff]  ;;  %v647_v63 = vld [vmem:[%s1624_s4 + $0x198] sm:$0xff]  ;;  %v1124_v1 = vpack.c.bf16 %v629_v58, %v628_v57  ;;  %v1094_v2 = vpack.c.bf16 %v615_v60, %v614_v59 }
  0x15   : > { %1087 = vmatprep.subr.bf16.mxu1 %v1086_v44  ;;  %v598_v3 = vld [vmem:[%s1624_s4 + $0x10] sm:$0xff]  ;;  %v599_v4 = vld [vmem:[%s1624_s4 + $0x18] sm:$0xff]  ;;  %v1126_v6 = vpack.c.bf16 %v647_v63, %v646_v62  ;;  %v616_v9 = vld [vmem:[%s1624_s4 + $0xa0] sm:$0xff] }
  0x16   : > { %v630_v5 = vld [vmem:[%s1624_s4 + $0x110] sm:$0xff]  ;;  %v631_v8 = vld [vmem:[%s1624_s4 + $0x118] sm:$0xff]  ;;  %v617_v10 = vld [vmem:[%s1624_s4 + $0xa8] sm:$0xff]  ;;  %v1096_v14 = vpack.c.bf16 %v599_v4, %v598_v3 }
  0x17   : > { %1073 = vmatpush1.bf16.msra.mxu0 %v1072_v49  ;;  %v334_v11 = vld [vmem:[%s1393_s10 + $0x8] sm:$0xff]  ;;  %v648_v12 = vld [vmem:[%s1624_s4 + $0x1a0] sm:$0xff]  ;;  %v1128_v15 = vpack.c.bf16 %v631_v8, %v630_v5  ;;  %v1098_v16 = vpack.c.bf16 %v617_v10, %v616_v9  ;;  %v618_v21 = vld [vmem:[%s1624_s4 + $0xb0] sm:$0xff] }
  0x18   : > { %1089 = vmatpush1.bf16.msra.mxu1 %v1088_v52  ;;  %1091 = vmatprep.subr.bf16.mxu0 %v1090_v53  ;;  %v649_v13 = vld [vmem:[%s1624_s4 + $0x1a8] sm:$0xff]  ;;  %v600_v17 = vld [vmem:[%s1624_s4 + $0x20] sm:$0xff]  ;;  %v619_v22 = vld [vmem:[%s1624_s4 + $0xb8] sm:$0xff] }
  0x19   : > { %1123 = vmatprep.subr.bf16.mxu1 %v1122_v54  ;;  %v601_v18 = vld [vmem:[%s1624_s4 + $0x28] sm:$0xff]  ;;  %v632_v19 = vld [vmem:[%s1624_s4 + $0x120] sm:$0xff]  ;;  %v650_v23 = vld [vmem:[%s1624_s4 + $0x1b0] sm:$0xff]  ;;  %v1102_v27 = vpack.c.bf16 %v619_v22, %v618_v21 }
  0x1a   : > { %975 = vmatmul.mubr.msk.f32.vlgmr.msra.gmra.mrb[0].mxu0 %vm367_vm0, %v333_v61  ;;  %v633_v20 = vld [vmem:[%s1624_s4 + $0x128] sm:$0xff]  ;;  %v651_v24 = vld [vmem:[%s1624_s4 + $0x1b8] sm:$0xff]  ;;  %v1100_v25 = vpack.c.bf16 %v601_v18, %v600_v17  ;;  %v602_v28 = vld [vmem:[%s1624_s4 + $0x30] sm:$0xff] }
  0x1b   : > { %977 = vmatmul.mubr.msk.f32.vlgmr.msra.gmra.mrb[0].mxu1 %vm367_vm0, %v333_v61  ;;  %444 = vmatprep.mubr.f32.mxu0 %v1203_v7  ;;  %v1132_v26 = vpack.c.bf16 %v633_v20, %v632_v19  ;;  %v603_v29 = vld [vmem:[%s1624_s4 + $0x38] sm:$0xff]  ;;  %v634_v30 = vld [vmem:[%s1624_s4 + $0x130] sm:$0xff]  ;;  %v1134_v31 = vpack.c.bf16 %v651_v24, %v650_v23  ;;  %v620_v33 = vld [vmem:[%s1624_s4 + $0xc0] sm:$0xff] }
  0x1c   : > { %521 = vmatprep.mubr.f32.mxu1 %v1203_v7  ;;  %1093 = vmatpush3.bf16.msra.mxu0 %v1092_v0  ;;  %v1130_v7 = vpack.c.bf16 %v649_v13, %v648_v12  ;;  %v635_v32 = vld [vmem:[%s1624_s4 + $0x138] sm:$0xff]  ;;  %v621_v34 = vld [vmem:[%s1624_s4 + $0xc8] sm:$0xff]  ;;  %v652_v35 = vld [vmem:[%s1624_s4 + $0x1c0] sm:$0xff]  ;;  %v1104_v37 = vpack.c.bf16 %v603_v29, %v602_v28 }
  0x1d   : > { %1125 = vmatpush3.bf16.msra.mxu1 %v1124_v1  ;;  %1095 = vmatprep.subr.bf16.mxu0 %v1094_v2  ;;  %v653_v36 = vld [vmem:[%s1624_s4 + $0x1c8] sm:$0xff]  ;;  %v1136_v38 = vpack.c.bf16 %v635_v32, %v634_v30  ;;  %v1106_v39 = vpack.c.bf16 %v621_v34, %v620_v33  ;;  %v604_v40 = vld [vmem:[%s1624_s4 + $0x40] sm:$0xff]  ;;  %v622_v45 = vld [vmem:[%s1624_s4 + $0xd0] sm:$0xff] }
  0x1e   : > { %976 = vmatmul.mubr.msk.f32.gmra.mrb[2].mxu0 %vm367_vm0, %v334_v11  ;;  %1127 = vmatprep.subr.bf16.mxu1 %v1126_v6  ;;  %v605_v41 = vld [vmem:[%s1624_s4 + $0x48] sm:$0xff]  ;;  %v636_v42 = vld [vmem:[%s1624_s4 + $0x140] sm:$0xff]  ;;  %v1138_v43 = vpack.c.bf16 %v653_v36, %v652_v35  ;;  %v623_v46 = vld [vmem:[%s1624_s4 + $0xd8] sm:$0xff] }
  0x1f   : > { %978 = vmatmul.mubr.msk.f32.gmra.mrb[2].mxu1 %vm367_vm0, %v334_v11  ;;  %v637_v44 = vld [vmem:[%s1624_s4 + $0x148] sm:$0xff]  ;;  %v654_v47 = vld [vmem:[%s1624_s4 + $0x1d0] sm:$0xff]  ;;  %v655_v48 = vld [vmem:[%s1624_s4 + $0x1d8] sm:$0xff]  ;;  %v1108_v49 = vpack.c.bf16 %v605_v41, %v604_v40  ;;  %v1110_v51 = vpack.c.bf16 %v623_v46, %v622_v45 }
  0x20   : > { %1097 = vmatpush3.bf16.msra.mxu0 %v1096_v14  ;;  %v1140_v50 = vpack.c.bf16 %v637_v44, %v636_v42  ;;  %v606_v52 = vld [vmem:[%s1624_s4 + $0x50] sm:$0xff]  ;;  %v607_v53 = vld [vmem:[%s1624_s4 + $0x58] sm:$0xff]  ;;  %v1142_v54 = vpack.c.bf16 %v655_v48, %v654_v47  ;;  %v624_v59 = vld [vmem:[%s1624_s4 + $0xe0] sm:$0xff] }
  0x21   : > { %1129 = vmatpush3.bf16.msra.mxu1 %v1128_v15  ;;  %1099 = vmatprep.subr.bf16.mxu0 %v1098_v16  ;;  %v638_v55 = vld [vmem:[%s1624_s4 + $0x150] sm:$0xff]  ;;  %v639_v56 = vld [vmem:[%s1624_s4 + $0x158] sm:$0xff]  ;;  %v1112_v57 = vpack.c.bf16 %v607_v53, %v606_v52  ;;  %v625_v60 = vld [vmem:[%s1624_s4 + $0xe8] sm:$0xff] }
  0x22   : > { %1131 = vmatprep.subr.bf16.mxu1 %v1130_v7  ;;  %v1144_v58 = vpack.c.bf16 %v639_v56, %v638_v55  ;;  %v1114_v61 = vpack.c.bf16 %v625_v60, %v624_v59  ;;  %v656_v62 = vld [vmem:[%s1624_s4 + $0x1e0] sm:$0xff]  ;;  %v657_v63 = vld [vmem:[%s1624_s4 + $0x1e8] sm:$0xff]  ;;  %v626_v8 = vld [vmem:[%s1624_s4 + $0xf0] sm:$0xff]  ;;  %v530_v7 = vlaneseq }
  0x23   : > { %v608_v0 = vld [vmem:[%s1624_s4 + $0x60] sm:$0xff]  ;;  %v1146_v1 = vpack.c.bf16 %v657_v63, %v656_v62  ;;  %v609_v2 = vld [vmem:[%s1624_s4 + $0x68] sm:$0xff]  ;;  %v627_v9 = vld [vmem:[%s1624_s4 + $0xf8] sm:$0xff] }
  0x24   : > { %1101 = vmatpush3.bf16.msra.mxu0 %v1100_v25  ;;  %v640_v3 = vld [vmem:[%s1624_s4 + $0x160] sm:$0xff]  ;;  %v1116_v4 = vpack.c.bf16 %v609_v2, %v608_v0  ;;  %v641_v5 = vld [vmem:[%s1624_s4 + $0x168] sm:$0xff]  ;;  %v658_v10 = vld [vmem:[%s1624_s4 + $0x1f0] sm:$0xff]  ;;  %v1118_v11 = vpack.c.bf16 %v627_v9, %v626_v8  ;;  %v1583_v20 = vshrl.u32 %v530_v7, 7 }
  0x25   : > { %1133 = vmatpush3.bf16.msra.mxu1 %v1132_v26  ;;  %1103 = vmatprep.subr.bf16.mxu0 %v1102_v27  ;;  %v1148_v6 = vpack.c.bf16 %v641_v5, %v640_v3  ;;  %v659_v12 = vld [vmem:[%s1624_s4 + $0x1f8] sm:$0xff]  ;;  %v610_v13 = vld [vmem:[%s1624_s4 + $0x70] sm:$0xff]  ;;  %v528_v22 = vld [vmem:[%s1622_s2] sm:$0xf]  ;;  %v817_v3 = vstv %s979_s19 }
  0x26   : > { %1135 = vmatprep.subr.bf16.mxu1 %v1134_v31  ;;  %v611_v14 = vld [vmem:[%s1624_s4 + $0x78] sm:$0xff]  ;;  %v1150_v15 = vpack.c.bf16 %v659_v12, %v658_v10  ;;  %v642_v17 = vld [vmem:[%s1624_s4 + $0x170] sm:$0xff]  ;;  %v532_v21 = vsub.s32 0, %v1583_v20  ;;  %v540_v23 = vsub.s32 2, %v1583_v20  ;;  %v536_v24 = vsub.s32 1, %v1583_v20 }
  0x27   : > { %v1120_v16 = vpack.c.bf16 %v611_v14, %v610_v13  ;;  %v643_v18 = vld [vmem:[%s1624_s4 + $0x178] sm:$0xff]  ;;  %v544_v25 = vsub.s32 3, %v1583_v20  ;;  %v558_v26 = vld [vmem:[%s1623_s3] sm:$0xf]  ;;  %v816_v5 = vadd.s32 8, %v1583_v20 }
  0x28   : > { %1105 = vmatpush3.bf16.msra.mxu0 %v1104_v37  ;;  %v1152_v19 = vpack.c.bf16 %v643_v18, %v642_v17  ;;  %v533_v27 = vrot.slane %v528_v22, %v532_v21  ;;  %v541_v28 = vrot.slane %v528_v22, %v540_v23  ;;  %v537_v29 = vrot.slane %v528_v22, %v536_v24 }
  0x29   : > { %1137 = vmatpush3.bf16.msra.mxu1 %v1136_v38  ;;  %1107 = vmatprep.subr.bf16.mxu0 %v1106_v39  ;;  %v563_v30 = vrot.slane %v558_v26, %v532_v21  ;;  %v545_v31 = vrot.slane %v528_v22, %v544_v25  ;;  %v571_v33 = vrot.slane %v558_v26, %v540_v23 }
  0x2a   : > { %1139 = vmatprep.subr.bf16.mxu1 %v1138_v43  ;;  %v567_v34 = vrot.slane %v558_v26, %v536_v24  ;;  %v575_v38 = vrot.slane %v558_v26, %v544_v25  ;;  %v819_v14 = vadd.s32 %v817_v3, %v816_v5 }
  0x2c   : > { %1109 = vmatpush3.bf16.msra.mxu0 %v1108_v49  ;;  %vm821_vm2 = vcmp.lt.s32.totalorder %v819_v14, 24 }
  0x2d   : > { %1141 = vmatpush3.bf16.msra.mxu1 %v1140_v50  ;;  %1111 = vmatprep.subr.bf16.mxu0 %v1110_v51 }
  0x2e   : > { %1143 = vmatprep.subr.bf16.mxu1 %v1142_v54 }
  0x30   : > { %1113 = vmatpush3.bf16.msra.mxu0 %v1112_v57 }
  0x31   : > { %1145 = vmatpush3.bf16.msra.mxu1 %v1144_v58  ;;  %1115 = vmatprep.subr.bf16.mxu0 %v1114_v61 }
  0x32   : > { %1147 = vmatprep.subr.bf16.mxu1 %v1146_v1 }
  0x34   : > { %1117 = vmatpush3.bf16.msra.mxu0 %v1116_v4 }
  0x35   : > { %1149 = vmatpush3.bf16.msra.mxu1 %v1148_v6  ;;  %1119 = vmatprep.subr.bf16.mxu0 %v1118_v11  ;;  %v818_v11 = vadd.s32 %v817_v3, %v1583_v20 }
  0x36   : > { %1151 = vmatprep.subr.bf16.mxu1 %v1150_v15 }
  0x37   : > { %vm820_vm1 = vcmp.lt.s32.totalorder %v818_v11, 24 }
  0x38   : > { %1121 = vmatpush3.bf16.msra.mxu0 %v1120_v16 }
  0x39   : > { %1153 = vmatpush3.bf16.msra.mxu1 %v1152_v19 }
  0xed   : > { %v440_v32 = vpop.f32.mrb[0].mxu0 }
  0xee   : > { %v550_v35 = vmul.f32 %v533_v27, %v440_v32  ;;  %v517_v36 = vpop.f32.mrb[0].mxu1  ;;  %v442_v37 = vpop.f32.mrb[1].mxu0 }
  0xef   : > { %v552_v39 = vmul.f32 %v541_v28, %v517_v36  ;;  %v551_v40 = vmul.f32 %v537_v29, %v442_v37  ;;  %v519_v41 = vpop.f32.mrb[1].mxu1 }
  0xf0   : > { %v580_v42 = vadd.f32 %v563_v30, %v550_v35  ;;  %v553_v43 = vmul.f32 %v545_v31, %v519_v41 }
  0xf1   : > { %v582_v44 = vadd.f32 %v571_v33, %v552_v39  ;;  %v581_v45 = vadd.f32 %v567_v34, %v551_v40  ;;  %v446_v46 = vpop.f32.mrb[2].mxu0 }
  0xf2   : > { %v583_v47 = vadd.f32 %v575_v38, %v553_v43  ;;  %v554_v48 = vmul.f32 %v533_v27, %v446_v46  ;;  %v523_v49 = vpop.f32.mrb[2].mxu1  ;;  %v448_v50 = vpop.f32.mrb[3].mxu0  ;;  %v588_v55 = vmax.f32 %v580_v42, 0.0 }
  0xf3   : > { %v589_v51 = vmax.f32 %v581_v45, 0.0  ;;  %v556_v52 = vmul.f32 %v541_v28, %v523_v49  ;;  %v555_v53 = vmul.f32 %v537_v29, %v448_v50  ;;  %v525_v54 = vpop.f32.mrb[3].mxu1  ;;  %v590_v59 = vmax.f32 %v582_v44, 0.0 }
  0xf4   : > { %v591_v56 = vmax.f32 %v583_v47, 0.0  ;;  %v584_v57 = vadd.f32 %v563_v30, %v554_v48  ;;  %v557_v58 = vmul.f32 %v545_v31, %v525_v54 }
  0xf5   : > { %v586_v60 = vadd.f32 %v571_v33, %v556_v52  ;;  %v585_v61 = vadd.f32 %v567_v34, %v555_v53  ;;  %724 = vmatprep.mubr.f32.mxu0 %v589_v51 }
  0xf6   : > { %v587_v62 = vadd.f32 %v575_v38, %v557_v58  ;;  %799 = vmatprep.mubr.f32.mxu1 %v591_v56  ;;  %725 = vmatmul.mubr.f32.vlgmr.msra.gmra.mrb[4].mxu0 %v588_v55  ;;  %v592_v0 = vmax.f32 %v584_v57, 0.0 }
  0xf7   : > { %v593_v63 = vmax.f32 %v585_v61, 0.0  ;;  %800 = vmatmul.mubr.f32.vlgmr.msra.gmra.mrb[4].mxu1 %v590_v59  ;;  %v594_v2 = vmax.f32 %v586_v60, 0.0 }
  0xf8   : > { %v595_v1 = vmax.f32 %v587_v62, 0.0 }
  0xf9   : > { %729 = vmatprep.mubr.f32.mxu0 %v593_v63 }
  0xfa   : > { %804 = vmatprep.mubr.f32.mxu1 %v595_v1  ;;  %730 = vmatmul.mubr.f32.gmra.mrb[6].mxu0 %v592_v0 }
  0xfb   : > { %805 = vmatmul.mubr.f32.gmra.mrb[6].mxu1 %v594_v2 }
 0x1c9   : > { %v1014_v4 = vpop.f32.mrb[4].mxu0 }
 0x1ca   : > { %v1052_v6 = vpop.f32.mrb[4].mxu1  ;;  %v1015_v8 = vpop.f32.mrb[5].mxu0 }
 0x1cb   : > { %v1016_v9 = vadd.f32 %v1015_v8, %v1014_v4  ;;  %v1053_v10 = vpop.f32.mrb[5].mxu1 }
 0x1cc   : > { %v1054_v12 = vadd.f32 %v1053_v10, %v1052_v6 }
 0x1cd   : > { %v1017_v13 = vpop.f32.mrb[6].mxu0 }
 0x1ce   : > { %v802_v15 = vadd.f32 %v1054_v12, %v1016_v9  ;;  %v1055_v16 = vpop.f32.mrb[6].mxu1  ;;  %v1018_v17 = vpop.f32.mrb[7].mxu0 }
 0x1cf   : > { %v1019_v18 = vadd.f32 %v1018_v17, %v1017_v13  ;;  %v1056_v19 = vpop.f32.mrb[7].mxu1 }
 0x1d0   : > { %810 = vst [vmem:[%s316_s21] sm:$0xff] %v802_v15  ;;  %v1057_v7 = vadd.f32 %v1056_v19, %v1055_v16  ;;  %v822_v20 = vsel %vm820_vm1, %v802_v15, 0.0 }
 0x1d1   : > { %v829_v23 = vmul.f32 %v822_v20, %v822_v20 }
 0x1d2   : > { %v807_v21 = vadd.f32 %v1057_v7, %v1019_v18 }
 0x1d4   : > { %811 = vst [vmem:[%s316_s21 + $0x8] sm:$0xff] %v807_v21  ;;  %v823_v22 = vsel %vm821_vm2, %v807_v21, 0.0 }
 0x1d5   : > { %v825_v24 = vadd.f32 %v823_v22, %v822_v20  ;;  %v830_v25 = vmul.f32 %v823_v22, %v823_v22 }
 0x1d7   : > { %v831_v26 = vadd.f32 %v830_v25, %v829_v23  ;;  %827 = vst [vmem:[%s322_s23] sm:$0xff] %v825_v24 }
 0x1d9   : > { %833 = vst [vmem:[%s326_s8] sm:$0xff] %v831_v26 }
 0x1da PF: > { %s18_s26 = sadd.s32 1, %s1201_s26   ;;  %s1629_s24 = smov %s1197_s25 }
 0x1db   : > { %p15_p6 = scmp.ge.s32.totalorder %s18_s26, 4   ;;  %s1630_s25 = smov %s1632_s27 }
 0x1dd   :  { %17 = sbr.rel (!%p15_p6) target bundleno = 2 (0x2), region = 98 }

</bundles_post_ra>
